<compile_context>
chip_gen: v5e
topology: v5e:2x2
jax: 0.10.0
libtpu: 0.0.40
codegen_flags: <defaults>
</compile_context>

<pallas_src>
import jax
import jax.numpy as jnp
from jax.experimental import pallas as pl
from jax.experimental.pallas import tpu as pltpu


# ----------------------------------------------------------------------------
# Kernel 1 (common path, position_ids=None):
#   out[b, :] = x[b, :] + pe_slice[0, :]        on a lane-dense (B, S*H) layout
# ----------------------------------------------------------------------------
def _add_pos_kernel(x_ref, pe_ref, o_ref):
    # x_ref:  (B, S*H)   input embeddings, flattened per batch element
    # pe_ref: (1, S*H)   pe_table[:S] flattened (broadcast over batch)
    # o_ref:  (B, S*H)
    o_ref[...] = (x_ref[...] + pe_ref[...]).astype(o_ref.dtype)
    # TODO(synk): for training-mode dropout (hidden_dropout > 0), scale/mask
    #             here using pltpu.prng_seed + pltpu.prng_random_bits.


# ----------------------------------------------------------------------------
# Kernel 2 (explicit position_ids):
#   row-wise gather from the VMEM-resident table using SMEM scalar ids,
#   then one full-block add + store.
# ----------------------------------------------------------------------------
def _gather_add_kernel(ids_ref, x_ref, pe_ref, o_ref, pos_scratch):
    # ids_ref:     SMEM (N,)  int32 position ids (N = B*S), scalar reads
    # x_ref:       VMEM (N, H) input embeddings, one token per row
    # pe_ref:      VMEM (P, H) full position-embedding table
    # o_ref:       VMEM (N, H)
    # pos_scratch: VMEM (N, H) f32 gathered positional rows
    N, _ = x_ref.shape
    # NOTE: ids are assumed to be valid (0 <= id < P), matching nn.Embedding's
    # contract; out-of-range ids are undefined behaviour here.
    for i in range(N):  # static, fully unrolled (N is tiny)
        idx = ids_ref[i]
        pos_scratch[pl.ds(i, 1), :] = pe_ref[pl.ds(idx, 1), :]
    o_ref[...] = (x_ref[...] + pos_scratch[...]).astype(o_ref.dtype)
    # TODO(synk): training-mode dropout (hidden_dropout > 0) not implemented.


# ----------------------------------------------------------------------------
# Wrapper
# ----------------------------------------------------------------------------
def positional_encoding(x, pe_table, position_ids=None):
    """x: (B, S, H) embeddings, pe_table: (P, H), position_ids: (B, S) or None."""
    B, S, H = x.shape
    P, _ = pe_table.shape

    if position_ids is None:
        # Common path: positions are arange(S) -> contiguous slice of the table.
        # Flatten to a lane-dense layout (last dim S*H; 256 = 2*128 here) so the
        # single store is an unmasked full-lane slab.
        x_flat = x.reshape(B, S * H)
        pe_flat = pe_table[:S].reshape(1, S * H)
        out_flat = pl.pallas_call(
            _add_pos_kernel,
            out_shape=jax.ShapeDtypeStruct((B, S * H), x.dtype),
            in_specs=[
                pl.BlockSpec(memory_space=pltpu.MemorySpace.VMEM),  # x (flat)
                pl.BlockSpec(memory_space=pltpu.MemorySpace.VMEM),  # pe slice
            ],
            out_specs=pl.BlockSpec(memory_space=pltpu.MemorySpace.VMEM),
        )(x_flat, pe_flat)
        return out_flat.reshape(B, S, H)

    # Explicit / arbitrary position_ids: scalar ids in SMEM + in-kernel row
    # gather from the VMEM-resident table (no one-hot matmul).
    N = B * S
    ids_flat = position_ids.astype(jnp.int32).reshape(N)
    x_rows = x.reshape(N, H)
    out_rows = pl.pallas_call(
        _gather_add_kernel,
        out_shape=jax.ShapeDtypeStruct((N, H), x.dtype),
        in_specs=[
            pl.BlockSpec(memory_space=pltpu.MemorySpace.SMEM),   # position ids
            pl.BlockSpec(memory_space=pltpu.MemorySpace.VMEM),   # x rows
            pl.BlockSpec(memory_space=pltpu.MemorySpace.VMEM),   # full PE table
        ],
        out_specs=pl.BlockSpec(memory_space=pltpu.MemorySpace.VMEM),
        scratch_shapes=[pltpu.VMEM((N, H), jnp.float32)],
    )(ids_flat, x_rows, pe_table)
    return out_rows.reshape(B, S, H)


# ----------------------------------------------------------------------------
# Pure-JAX reference for sanity checking
# ----------------------------------------------------------------------------
def reference_positional_encoding(x, pe_table, position_ids=None):
    B, S, H = x.shape
    if position_ids is None:
        position_ids = jnp.broadcast_to(jnp.arange(S)[None, :], (B, S))
    pos_emb = jnp.take(pe_table, position_ids, axis=0)        # (B, S, H)
    return x + pos_emb                                         # dropout(0.0) = id


# ----------------------------------------------------------------------------
# Main
# ----------------------------------------------------------------------------
if __name__ == "__main__":
    batch, seq_len, hidden_size = 2, 8, 32
    max_position_embeddings = 64
    initializer_range = 0.02
    # hidden_dropout = 0.0, position_embedding_type = 'absolute'

    key = jax.random.PRNGKey(0)
    k_x, k_pe, k_pid = jax.random.split(key, 3)

    x = jax.random.normal(k_x, (batch, seq_len, hidden_size), dtype=jnp.float32)
    pe_table = initializer_range * jax.random.normal(
        k_pe, (max_position_embeddings, hidden_size), dtype=jnp.float32)

    # Case 1: default position_ids (arange over seq_len) — lane-dense add path.
    out_default = jax.block_until_ready(positional_encoding(x, pe_table))
    ref_default = reference_positional_encoding(x, pe_table)
    assert out_default.shape == (batch, seq_len, hidden_size)
    assert jnp.allclose(out_default, ref_default, atol=1e-6, rtol=1e-6), (
        f"max abs diff = {jnp.max(jnp.abs(out_default - ref_default))}")

    # Case 2: explicit (arbitrary) position_ids — SMEM ids + VMEM row gather.
    pos_ids = jax.random.randint(
        k_pid, (batch, seq_len), 0, max_position_embeddings, dtype=jnp.int32)
    out_explicit = jax.block_until_ready(
        positional_encoding(x, pe_table, pos_ids))
    ref_explicit = reference_positional_encoding(x, pe_table, pos_ids)
    assert jnp.allclose(out_explicit, ref_explicit, atol=1e-6, rtol=1e-6), (
        f"max abs diff = {jnp.max(jnp.abs(out_explicit - ref_explicit))}")

    print("KERNEL_OK")
</pallas_src>

<mosaic_0001>
module attributes {stable_mosaic.version = 11 : i64} {
  func.func @_add_pos_kernel(%arg0: memref<2x256xf32, #tpu.memory_space<vmem>>, %arg1: memref<1x256xf32, #tpu.memory_space<vmem>>, %arg2: memref<2x256xf32, #tpu.memory_space<vmem>>) attributes {dimension_semantics = [], scalar_prefetch = 0 : i64, scratch_operands = 0 : i64, tpu.core_type = #tpu.core_type<tc>} {
    %c0 = arith.constant 0 : index
    %c0_0 = arith.constant 0 : index
    %0 = vector.load %arg0[%c0, %c0_0] : memref<2x256xf32, #tpu.memory_space<vmem>>, vector<2x256xf32>
    %c0_1 = arith.constant 0 : index
    %c0_2 = arith.constant 0 : index
    %1 = vector.load %arg1[%c0_1, %c0_2] : memref<1x256xf32, #tpu.memory_space<vmem>>, vector<1x256xf32>
    %2 = vector.broadcast %1 : vector<1x256xf32> to vector<2x256xf32>
    %3 = arith.addf %0, %2 : vector<2x256xf32>
    %c0_3 = arith.constant 0 : index
    %c0_4 = arith.constant 0 : index
    %4 = vector.load %arg2[%c0_3, %c0_4] : memref<2x256xf32, #tpu.memory_space<vmem>>, vector<2x256xf32>
    tpu.vector_store %arg2[%c0_3, %c0_4], %3 {strides = array<i32>} : memref<2x256xf32, #tpu.memory_space<vmem>>, vector<2x256xf32>,
    return
  }
}

</mosaic_0001>

<bundles_post_ra>
// kernel: tpu_custom_call.1
= control target key start
LH: loop header
LB: loop body
LE: loop exit
PB: predicated region body
PF: predicated region fallthrough
CT: control target
= control target key end

     0   :  { %7 = vsyncpa [#allocation3], 0  ;;  %s177_s0 = inlined_call_operand.hbm [shape: f32[2,256], index: 0, kind: input, shape index: {}]   ;;  %s178_s1 = inlined_call_operand.hbm [shape: f32[1,256], index: 1, kind: input, shape index: {}]   ;;  %s179_s2 = inlined_call_operand.hbm [shape: f32[2,256], index: 2, kind: output, shape index: {}]  }
   0x1   :  { %8 = vsyncpa [#allocation6], 0 }
   0x2   :  { %9 = vsyncpa [#allocation4], 0  ;;  %s15_s11 = sshll.u32 %s177_s0, 4  ;;  %s150_s12 = smov [#allocation2]   ;;  %s16_s11 = int_to_ptr.hbm [resolvable:$true] %s15_s11 }
   0x3   :  { %s17_s13 = sshll.u32 %s150_s12, 4  ;;  %s26_s16 = sshll.u32 %s178_s1, 4  ;;  %s18_s13 = int_to_ptr.vmem [resolvable:$true] %s17_s13  ;;  %s27_s16 = int_to_ptr.hbm [resolvable:$true] %s26_s16 }
   0x4   :  { %20 = dma.hbm_to_vmem [thread:$0]  %s16_s11, 64, %s18_s13, [#allocation3]  }
   0x5   :  { %s151_s17 = smov [#allocation5]  }
   0x6   :  { %s28_s18 = sshll.u32 %s151_s17, 4  ;;  %s29_s18 = int_to_ptr.vmem [resolvable:$true] %s28_s18 }
   0x7   :  { %31 = dma.hbm_to_vmem [thread:$0]  %s27_s16, 32, %s29_s18, [#allocation6]  }
   0x8   :  { %144 = dma.done.wait [#allocation3], 64  }
   0x9   :  { %145 = vsyncadd [#allocation3], 4294967232 }
   0xa   :  { %146 = dma.done.wait [#allocation6], 32  }
   0xb   :  { %147 = vsyncadd [#allocation6], 4294967264  ;;  %v41_v0 = vld [vmem:[#allocation5] sm:$0x3]  ;;  %vm46_vm0 = vcmask 1041408   ;;  %s152_s0 = smov [#allocation7]  }
   0xc   :  { %v43_v1 = vperm.slane %v41_v0, 0  ;;  %v44_v2 = vperm.slane %v41_v0, 1  ;;  %v40_v3 = vld [vmem:[#allocation2] sm:$0xf]  ;;  %s56_s19 = sshll.u32 %s152_s0, 4  ;;  %s58_s21 = sshll.u32 %s179_s2, 4  ;;  %s57_s19 = int_to_ptr.vmem [resolvable:$true] %s56_s19  ;;  %s59_s21 = int_to_ptr.hbm [resolvable:$true] %s58_s21 }
   0xe   :  { %v45_v4 = vrot.slane %v44_v2, 6 }
  0x10   :  { %v47_v5 = vsel %vm46_vm0, %v43_v1, %v45_v4 }
  0x11   :  { %v49_v6 = vadd.f32 %v47_v5, %v40_v3 }
  0x13   :  { %50 = vst [vmem:[#allocation7] sm:$0xf] %v49_v6 }
  0x14   :  { %61 = dma.vmem_to_hbm [thread:$0]  %s57_s19, 64, %s59_s21, [#allocation4]  }
  0x15   :  { %148 = dma.done.wait [#allocation4], 64  }
  0x16   :  { %149 = vsyncadd [#allocation4], 4294967232 }
  0x17   :  { %66 = vsyncpa [#allocation3], 1 }
  0x18   :  { %67 = vsyncpa [#allocation6], 1 }
  0x19   :  { %68 = vsyncpa [#allocation4], 1 }

</bundles_post_ra>
